<compile_context>
chip_gen: v5e
topology: v5e:2x2
jax: 0.10.0
libtpu: 0.0.40
codegen_flags: <defaults>
</compile_context>

<pallas_src>
import functools

import numpy as np
import jax
import jax.numpy as jnp
from jax.experimental import pallas as pl
from jax.experimental.pallas import tpu as pltpu


def _round_up(x, m):
    return (x + m - 1) // m * m


def _disc_kernel(d_ref, a_ref, w1_ref, w2_ref, out_ref, *, f_pad):
    d = d_ref[...]                                                  # (TG, 4P+1)
    a = jnp.dot(d, a_ref[...], preferred_element_type=jnp.float32,
                precision=jax.lax.Precision.HIGHEST)                # (TG, 2*f_pad)
    # left factor * right factor -> packed [deg1(4), quad(10)] per pack member,
    # plus a constant-1 feature column (carries the b1/b2 bias path).
    feat = a[:, :f_pad] * a[:, f_pad:]                              # (TG, f_pad)
    h = jnp.maximum(
        jnp.dot(feat, w1_ref[...], preferred_element_type=jnp.float32,
                precision=jax.lax.Precision.HIGHEST), 0.0)          # (TG, 15)
    y = jnp.dot(h, w2_ref[...], preferred_element_type=jnp.float32,
                precision=jax.lax.Precision.HIGHEST)                # (TG, 1)
    out_ref[...] = jnp.broadcast_to(y, out_ref.shape)               # (TG, P) lane-dense


def _build_factor_matrix(packing_degree, f_pad):
    """(4P+1, 2*f_pad) one-hot matrix selecting both outer-product factors."""
    rows, cols = np.triu_indices(4)          # torch.masked_select(triu) order
    P = packing_degree
    A = np.zeros((4 * P + 1, 2 * f_pad), np.float32)
    ones_row = 4 * P                         # wrapper appends a ones column here
    for p in range(P):
        base = p * 14
        for i in range(4):                   # deg1 passthrough columns
            A[p * 4 + i, base + i] = 1.0             # left factor  = deg1[i]
            A[ones_row, f_pad + base + i] = 1.0      # right factor = 1
        for j in range(10):                  # upper-triangular quadratic columns
            A[p * 4 + int(rows[j]), base + 4 + j] = 1.0          # left  = deg1[rows[j]]
            A[p * 4 + int(cols[j]), f_pad + base + 4 + j] = 1.0  # right = deg1[cols[j]]
    A[ones_row, 14 * P] = 1.0                # constant-1 feature column (both factors)
    A[ones_row, f_pad + 14 * P] = 1.0
    return A


def discriminator_forward(matrix, params, packing_degree):
    B = matrix.shape[0]
    assert B % packing_degree == 0
    P = packing_degree
    G = B // P

    deg1 = matrix.reshape(B, -1).astype(jnp.float32)                # nn.Flatten
    assert deg1.shape[1] == 4, "flattened feature dim must be 4 (triu(4,4) mask)"

    # Free wrapper-side packing: (B, 4) -> (G, 4P), plus a ones column.
    d_aug = jnp.concatenate(
        [deg1.reshape(G, 4 * P), jnp.ones((G, 1), jnp.float32)], axis=1)  # (G, 4P+1)

    # Fold all parameters into two matmul operands.
    w1, b1, w2, b2 = params                  # w1: (P*14, 14) i.e. forward is x @ w1 + b1
    n_feat = 14 * P + 1                      # +1 constant feature
    f_pad = _round_up(n_feat, 128)           # lane-aligned split point
    A = jnp.asarray(_build_factor_matrix(P, f_pad))                 # (4P+1, 2*f_pad)

    w1_aug = jnp.zeros((f_pad, 15), jnp.float32)
    w1_aug = w1_aug.at[:14 * P, :14].set(w1.astype(jnp.float32))
    w1_aug = w1_aug.at[14 * P, :14].set(b1.reshape(-1).astype(jnp.float32))
    w1_aug = w1_aug.at[14 * P, 14].set(1.0)  # relu(1) = 1 carries the b2 path
    w2_aug = jnp.concatenate(
        [w2.astype(jnp.float32), b2.reshape(1, 1).astype(jnp.float32)], axis=0)  # (15, 1)

    # Grid over the group axis: single full block for small G, 8-aligned tiles
    # (sharded across TensorCores on v7x) for large G.
    TG = G if G <= 512 else 512
    grid = (pl.cdiv(G, TG),)

    kernel = functools.partial(_disc_kernel, f_pad=f_pad)
    out_gp = pl.pallas_call(
        kernel,
        out_shape=jax.ShapeDtypeStruct((G, P), jnp.float32),
        grid=grid,
        in_specs=[
            pl.BlockSpec((TG, 4 * P + 1), lambda i: (i, 0)),
            pl.BlockSpec((4 * P + 1, 2 * f_pad), lambda i: (0, 0)),
            pl.BlockSpec((f_pad, 15), lambda i: (0, 0)),
            pl.BlockSpec((15, 1), lambda i: (0, 0)),
        ],
        out_specs=pl.BlockSpec((TG, P), lambda i: (i, 0)),
        compiler_params=pltpu.CompilerParams(dimension_semantics=("parallel",)),
    )(d_aug, A, w1_aug, w2_aug)

    # out_gp[g, p] = y[g] for every p.  The torch output is
    # vstack(P copies of y).T.reshape(B, 1), i.e. out[p*G + g] = y[g],
    # which is exactly out_gp.T.reshape(B, 1).
    return out_gp.T.reshape(B, 1)


def discriminator_reference(matrix, params, packing_degree):
    """Pure-JAX transcription of the PyTorch forward (for verification)."""
    B = matrix.shape[0]
    deg1 = matrix.reshape(B, -1).astype(jnp.float32)
    rows, cols = np.triu_indices(4)
    quad = deg1[:, rows] * deg1[:, cols]                 # masked_select(triu) order
    feat = jnp.concatenate([deg1, quad], axis=1)         # (B, 14)
    w1, b1, w2, b2 = params
    x = feat.reshape(B // packing_degree, packing_degree * 14)
    h = jnp.maximum(
        jnp.dot(x, w1, precision=jax.lax.Precision.HIGHEST) + b1, 0.0)
    y = jnp.dot(h, w2, precision=jax.lax.Precision.HIGHEST) + b2   # (B/P, 1)
    out = jnp.concatenate([y] * packing_degree, axis=0)            # torch.vstack
    out = out.T.reshape(B, 1)
    return out


if __name__ == "__main__":
    def make_case(key, batch, packing_degree):
        k1, k2, k3, k4, k5 = jax.random.split(key, 5)
        w1 = 0.1 * jax.random.normal(k1, (packing_degree * 14, 14), jnp.float32)
        b1 = 0.1 * jax.random.normal(k2, (1, 14), jnp.float32)
        w2 = 0.1 * jax.random.normal(k3, (14, 1), jnp.float32)
        b2 = 0.1 * jax.random.normal(k4, (1, 1), jnp.float32)
        matrix = jax.random.normal(k5, (batch, 2, 2), jnp.float32)  # flattens to 4 feats
        return matrix, (w1, b1, w2, b2)

    key = jax.random.PRNGKey(0)
    k_a, k_b = jax.random.split(key)
    for kk, batch, pdeg in ((k_a, 4, 2), (k_b, 24, 3)):
        matrix, params = make_case(kk, batch, pdeg)
        out = jax.block_until_ready(discriminator_forward(matrix, params, pdeg))
        ref = jax.block_until_ready(discriminator_reference(matrix, params, pdeg))
        assert out.shape == (batch, 1), out.shape
        np.testing.assert_allclose(np.asarray(out), np.asarray(ref),
                                   rtol=1e-5, atol=1e-5)
    print("KERNEL_OK")
</pallas_src>

<mosaic_0001>
module attributes {stable_mosaic.version = 11 : i64} {
  func.func @_disc_kernel(%arg0: i32, %arg1: memref<2x9xf32, #tpu.memory_space<vmem>>, %arg2: memref<9x256xf32, #tpu.memory_space<vmem>>, %arg3: memref<128x15xf32, #tpu.memory_space<vmem>>, %arg4: memref<15x1xf32, #tpu.memory_space<vmem>>, %arg5: memref<2x2xf32, #tpu.memory_space<vmem>>) attributes {dimension_semantics = [#tpu.dimension_semantics<parallel>], iteration_bounds = array<i64: 1>, scalar_prefetch = 0 : i64, scratch_operands = 0 : i64, tpu.core_type = #tpu.core_type<tc>, window_params = [{transform_indices = @transform_0, window_bounds = array<i64: 2, 9>}, {pipeline_mode = #tpu.pipeline_mode<synchronous>, transform_indices = @transform_1, window_bounds = array<i64: 9, 256>}, {pipeline_mode = #tpu.pipeline_mode<synchronous>, transform_indices = @transform_2, window_bounds = array<i64: 128, 15>}, {pipeline_mode = #tpu.pipeline_mode<synchronous>, transform_indices = @transform_3, window_bounds = array<i64: 15, 1>}, {transform_indices = @transform_4, window_bounds = array<i64: 2, 2>}]} {
    %c0 = arith.constant 0 : index
    %c0_0 = arith.constant 0 : index
    %0 = vector.load %arg1[%c0, %c0_0] : memref<2x9xf32, #tpu.memory_space<vmem>>, vector<2x9xf32>
    %c0_1 = arith.constant 0 : index
    %c0_2 = arith.constant 0 : index
    %1 = vector.load %arg2[%c0_1, %c0_2] : memref<9x256xf32, #tpu.memory_space<vmem>>, vector<9x256xf32>
    %cst = arith.constant dense<0.000000e+00> : vector<2x256xf32>
    %2 = tpu.matmul %0, %1, %cst {dimension_numbers = #tpu.dot_dimension_numbers<[1], [0], [0], [1], [0, 0, 1, 1], [], []>, precision = #tpu.contract_precision<fp32>} : vector<2x9xf32>, vector<9x256xf32>, vector<2x256xf32> -> vector<2x256xf32>
    %3 = vector.extract_strided_slice %2 {offsets = [0, 0], sizes = [2, 128], strides = [1, 1]} : vector<2x256xf32> to vector<2x128xf32>
    %4 = vector.extract_strided_slice %2 {offsets = [0, 128], sizes = [2, 128], strides = [1, 1]} : vector<2x256xf32> to vector<2x128xf32>
    %5 = arith.mulf %3, %4 : vector<2x128xf32>
    %c0_3 = arith.constant 0 : index
    %c0_4 = arith.constant 0 : index
    %6 = vector.load %arg3[%c0_3, %c0_4] : memref<128x15xf32, #tpu.memory_space<vmem>>, vector<128x15xf32>
    %cst_5 = arith.constant dense<0.000000e+00> : vector<2x15xf32>
    %7 = tpu.matmul %5, %6, %cst_5 {dimension_numbers = #tpu.dot_dimension_numbers<[1], [0], [0], [1], [0, 0, 1, 1], [], []>, precision = #tpu.contract_precision<fp32>} : vector<2x128xf32>, vector<128x15xf32>, vector<2x15xf32> -> vector<2x15xf32>
    %cst_6 = arith.constant 0.000000e+00 : f32
    %8 = vector.broadcast %cst_6 : f32 to vector<2x15xf32>
    %9 = arith.maximumf %7, %8 : vector<2x15xf32>
    %c0_7 = arith.constant 0 : index
    %c0_8 = arith.constant 0 : index
    %10 = vector.load %arg4[%c0_7, %c0_8] : memref<15x1xf32, #tpu.memory_space<vmem>>, vector<15x1xf32>
    %cst_9 = arith.constant dense<0.000000e+00> : vector<2x1xf32>
    %11 = tpu.matmul %9, %10, %cst_9 {dimension_numbers = #tpu.dot_dimension_numbers<[1], [0], [0], [1], [0, 0, 1, 1], [], []>, precision = #tpu.contract_precision<fp32>} : vector<2x15xf32>, vector<15x1xf32>, vector<2x1xf32> -> vector<2x1xf32>
    %12 = vector.shape_cast %11 : vector<2x1xf32> to vector<2x1xf32>
    %13 = vector.broadcast %12 : vector<2x1xf32> to vector<2x2xf32>
    %c0_10 = arith.constant 0 : index
    %c0_11 = arith.constant 0 : index
    %14 = vector.load %arg5[%c0_10, %c0_11] : memref<2x2xf32, #tpu.memory_space<vmem>>, vector<2x2xf32>
    tpu.vector_store %arg5[%c0_10, %c0_11], %13 {strides = array<i32>} : memref<2x2xf32, #tpu.memory_space<vmem>>, vector<2x2xf32>,
    return
  }
  func.func @transform_0(%arg0: i32) -> (i32, i32) {
    %c0_i32 = arith.constant 0 : i32
    %c0_i32_0 = arith.constant 0 : i32
    return %arg0, %c0_i32 : i32, i32
  }
  func.func @transform_1(%arg0: i32) -> (i32, i32) {
    %c0_i32 = arith.constant 0 : i32
    %c0_i32_0 = arith.constant 0 : i32
    %c0_i32_1 = arith.constant 0 : i32
    return %c0_i32, %c0_i32_0 : i32, i32
  }
  func.func @transform_2(%arg0: i32) -> (i32, i32) {
    %c0_i32 = arith.constant 0 : i32
    %c0_i32_0 = arith.constant 0 : i32
    %c0_i32_1 = arith.constant 0 : i32
    return %c0_i32, %c0_i32_0 : i32, i32
  }
  func.func @transform_3(%arg0: i32) -> (i32, i32) {
    %c0_i32 = arith.constant 0 : i32
    %c0_i32_0 = arith.constant 0 : i32
    %c0_i32_1 = arith.constant 0 : i32
    return %c0_i32, %c0_i32_0 : i32, i32
  }
  func.func @transform_4(%arg0: i32) -> (i32, i32) {
    %c0_i32 = arith.constant 0 : i32
    %c0_i32_0 = arith.constant 0 : i32
    return %arg0, %c0_i32 : i32, i32
  }
}

</mosaic_0001>

<bundles_post_ra>
// kernel: tpu_custom_call.1
= control target key start
LH: loop header
LB: loop body
LE: loop exit
PB: predicated region body
PF: predicated region fallthrough
CT: control target
= control target key end

     0   :  { %vm27_vm0 = vcmask 1040384   ;;  %vm23_vm1 = vcmask 72704   ;;  %s1278_s0 = inlined_call_operand.vmem [shape: f32[2,9], index: 0, kind: input, shape index: {}]   ;;  %s1279_s1 = inlined_call_operand.vmem [shape: f32[9,256], index: 1, kind: input, shape index: {}]   ;;  %s1280_s2 = inlined_call_operand.vmem [shape: f32[128,15], index: 2, kind: input, shape index: {}]   ;;  %s1281_s3 = inlined_call_operand.vmem [shape: f32[15,1], index: 3, kind: input, shape index: {}]   ;;  %s1282_s4 = inlined_call_operand.hbm [shape: f32[2,2], index: 4, kind: output, shape index: {}]  }
   0x1   :  { %v21_v0 = vld [vmem:[%s1279_s1 + $0x10] sm:$0x1]  ;;  %v22_v1 = vld [vmem:[%s1279_s1 + $0x18] sm:$0x1]  ;;  %v19_v2 = vld [vmem:[%s1279_s1] sm:$0xff] }
   0x2   :  { %v29_v3 = vsel %vm27_vm0, %v21_v0, 0  ;;  %v32_v4 = vsel %vm27_vm0, %v22_v1, 0  ;;  %v968_v5 = vand.u32 4294901760, %v19_v2  ;;  %v18_v6 = vld [vmem:[%s1278_s0] sm:$0x3]  ;;  %v20_v10 = vld [vmem:[%s1279_s1 + $0x8] sm:$0xff] }
   0x3   :  { %v973_v7 = vand.u32 4294901760, %v29_v3  ;;  %v25_v8 = vsel %vm23_vm1, %v18_v6, 0  ;;  %v975_v9 = vand.u32 4294901760, %v32_v4  ;;  %v368_v11 = vld [vmem:[%s1280_s2 + $0x78] sm:$0xff]  ;;  %v986_v14 = vand.u32 4294901760, %v20_v10  ;;  %v367_v15 = vld [vmem:[%s1280_s2 + $0x70] sm:$0xff] }
   0x4   :  { %v82_v12 = vsub.f32 %v19_v2, %v968_v5  ;;  %v984_v13 = vand.u32 4294901760, %v25_v8  ;;  %v995_v18 = vand.u32 4294901760, %v368_v11  ;;  %v366_v19 = vld [vmem:[%s1280_s2 + $0x68] sm:$0xff] }
   0x5   :  { %v76_v16 = vsub.f32 %v29_v3, %v973_v7  ;;  %133 = vmatpush.msra.mxu3 %v973_v7  ;;  %49 = vmatpush.msra.mxu0 %v973_v7  ;;  %v235_v17 = vsub.f32 %v32_v4, %v975_v9  ;;  %v1004_v22 = vsub.f32 %v20_v10, %v986_v14 }
   0x6   :  { %v1001_v20 = vsub.f32 %v25_v8, %v984_v13  ;;  %v83_v21 = vand.u32 4294901760, %v82_v12 }
   0x7   :  { %9 = vsyncpa [#allocation3], 0  ;;  %108 = vmatpush.msra.mxu2 %v76_v16  ;;  %135 = vmatpush.msra.mxu3 %v968_v5  ;;  %v77_v23 = vand.u32 4294901760, %v76_v16  ;;  %v236_v24 = vand.u32 4294901760, %v235_v17  ;;  %v1007_v25 = vand.u32 4294901760, %v367_v15  ;;  %v242_v28 = vand.u32 4294901760, %v1004_v22 }
   0x8   :  { %51 = vmatpush.msra.mxu0 %v968_v5  ;;  %v1011_v26 = vand.u32 4294901760, %v1001_v20  ;;  %v84_v27 = vsub.f32 %v82_v12, %v83_v21  ;;  %v1014_v29 = vand.u32 4294901760, %v366_v19  ;;  %v1017_v32 = vsub.f32 %v368_v11, %v995_v18  ;;  %v365_v33 = vld [vmem:[%s1280_s2 + $0x60] sm:$0xff]  ;;  %v364_v36 = vld [vmem:[%s1280_s2 + $0x58] sm:$0xff]  ;;  %v363_v45 = vld [vmem:[%s1280_s2 + $0x50] sm:$0xff]  ;;  %s894_s7 = sshll.u32 %s1282_s4, 4  ;;  %s895_s7 = int_to_ptr.hbm [resolvable:$true] %s894_s7 }
   0x9   :  { %111 = vmatpush.msra.mxu2 %v82_v12  ;;  %v78_v30 = vsub.f32 %v76_v16, %v77_v23  ;;  %v237_v31 = vsub.f32 %v235_v17, %v236_v24  ;;  %v243_v35 = vsub.f32 %v1004_v22, %v242_v28  ;;  %v1032_v40 = vsub.f32 %v367_v15, %v1007_v25  ;;  %v362_v48 = vld [vmem:[%s1280_s2 + $0x48] sm:$0xff]  ;;  %v361_v53 = vld [vmem:[%s1280_s2 + $0x40] sm:$0xff]  ;;  %v360_v57 = vld [vmem:[%s1280_s2 + $0x38] sm:$0xff] }
   0xa   :  { %160 = vmatpush.msrb.mxu0 %v77_v23  ;;  %114 = vmatmul.f32.vlgmr.msra.gmra.mxu2 %v1001_v20  ;;  %v55_v34 = vsub.f32 %v1001_v20, %v1011_v26  ;;  %v85_v39 = vand.u32 4294901760, %v84_v27  ;;  %v1035_v43 = vsub.f32 %v366_v19, %v1014_v29  ;;  %v1037_v44 = vand.u32 4294901760, %v365_v33  ;;  %v359_v62 = vld [vmem:[%s1280_s2 + $0x30] sm:$0xff]  ;;  %v357_v11 = vld [vmem:[%s1280_s2 + $0x20] sm:$0xff] }
   0xb   :  { %139 = vmatmul.f32.vlgmr.msra.gmra.mxu3 %v1011_v26  ;;  %208 = vmatpush.msrb.mxu2 %v975_v9  ;;  %v79_v37 = vand.u32 4294901760, %v78_v30  ;;  %v238_v38 = vand.u32 4294901760, %v237_v31  ;;  %v244_v42 = vand.u32 4294901760, %v243_v35  ;;  %v412_v46 = vand.u32 4294901760, %v1017_v32 }
   0xc   :  { %164 = vmatpush.msrb.mxu0 %v83_v21  ;;  %v56_v41 = vand.u32 4294901760, %v55_v34  ;;  %v1043_v47 = vand.u32 4294901760, %v364_v36  ;;  %v418_v49 = vand.u32 4294901760, %v1032_v40  ;;  %v1051_v50 = vsub.f32 %v365_v33, %v1037_v44 }
   0xd   :  { %80 = vmatpush.msra.mxu1 %v79_v37  ;;  %239 = vmatpush.msrb.mxu3 %v238_v38  ;;  %v1053_v51 = vand.u32 4294901760, %v363_v45  ;;  %v424_v52 = vand.u32 4294901760, %v1035_v43  ;;  %v413_v54 = vsub.f32 %v1017_v32, %v412_v46  ;;  %v1067_v56 = vand.u32 4294901760, %v362_v48 }
   0xe   :  { %57 = vmatmul.f32.vlgmr.msra.gmra.mxu0 %v56_v41  ;;  %210 = vmatpush.msrb.mxu2 %v986_v14  ;;  %v1065_v55 = vsub.f32 %v364_v36, %v1043_v47  ;;  %v419_v58 = vsub.f32 %v1032_v40, %v418_v49  ;;  %v430_v59 = vand.u32 4294901760, %v1051_v50  ;;  %v1082_v61 = vand.u32 4294901760, %v361_v53 }
   0xf   :  { %86 = vmatpush.msra.mxu1 %v85_v39  ;;  %245 = vmatpush.msrb.mxu3 %v244_v42  ;;  %v1080_v60 = vsub.f32 %v363_v45, %v1053_v51  ;;  %v425_v63 = vsub.f32 %v1035_v43, %v424_v52  ;;  %v414_v0 = vand.u32 4294901760, %v413_v54  ;;  %v1095_v2 = vsub.f32 %v362_v48, %v1067_v56  ;;  %v356_v54 = vld [vmem:[%s1280_s2 + $0x18] sm:$0xff] }
  0x10   :  { %88 = vmatmul.f32.vlgmr.msra.gmra.mxu1 %v984_v13  ;;  %319 = vmatpush.msra.mxu2 %v236_v24  ;;  %v436_v1 = vand.u32 4294901760, %v1065_v55  ;;  %v1097_v3 = vand.u32 4294901760, %v360_v57  ;;  %v1101_v4 = vand.u32 4294901760, %v359_v62  ;;  %v420_v6 = vand.u32 4294901760, %v419_v58  ;;  %v355_v58 = vld [vmem:[%s1280_s2 + $0x10] sm:$0xff] }
  0x11   :  { %185 = vmatpush.msrb.mxu1 %v973_v7  ;;  %267 = vmatpush.msra.mxu0 %v235_v17  ;;  %v431_v7 = vsub.f32 %v1051_v50, %v430_v59  ;;  %v442_v8 = vand.u32 4294901760, %v1080_v60  ;;  %v426_v10 = vand.u32 4294901760, %v425_v63  ;;  %v1140_v23 = vand.u32 4294901760, %v357_v11 }
  0x12   :  { %216 = vmatmul.f32.vlgmr.msrb.gmra.mxu2 %v56_v41  ;;  %344 = vmatpush.msra.mxu3 %v975_v9  ;;  %v437_v12 = vsub.f32 %v1065_v55, %v436_v1  ;;  %v1126_v15 = vsub.f32 %v360_v57, %v1097_v3  ;;  %v1133_v17 = vsub.f32 %v359_v62, %v1101_v4  ;;  %v1206_v57 = vand.u32 4294901760, %v356_v54 }
  0x13   :  { %247 = vmatmul.f32.vlgmr.msrb.gmra.mxu3 %v984_v13  ;;  %187 = vmatpush.msrb.mxu1 %v968_v5  ;;  %v358_v5 = vld [vmem:[%s1280_s2 + $0x28] sm:$0xff]  ;;  %v432_v19 = vand.u32 4294901760, %v431_v7  ;;  %v443_v21 = vsub.f32 %v1080_v60, %v442_v8  ;;  %v1160_v34 = vsub.f32 %v357_v11, %v1140_v23  ;;  %v1212_v63 = vand.u32 4294901760, %v355_v58 }
  0x14   :  { %323 = vmatpush.msra.mxu2 %v242_v28  ;;  %270 = vmatpush.msra.mxu0 %v1004_v22  ;;  %v1128_v16 = vand.u32 4294901760, %v358_v5  ;;  %v460_v27 = vand.u32 4294901760, %v1126_v15  ;;  %v466_v33 = vand.u32 4294901760, %v1133_v17  ;;  %v483_v62 = vsub.f32 %v356_v54, %v1206_v57 }
  0x15   :  { %292 = vmatpush.msra.mxu1 %v975_v9  ;;  %346 = vmatpush.msra.mxu3 %v986_v14  ;;  %v1112_v9 = vsub.f32 %v361_v53, %v1082_v61  ;;  %v444_v30 = vand.u32 4294901760, %v443_v21  ;;  %v478_v38 = vand.u32 4294901760, %v1160_v34  ;;  %vm717_vm2 = vcmask 1046528  }
  0x16   :  { %166 = vmatmul.f32.vlgmr.msrb.gmra.mxu0 %v984_v13  ;;  %513 = vmatpush.msrb.mxu2 %v1017_v32  ;;  %v1150_v28 = vsub.f32 %v358_v5, %v1128_v16  ;;  %v461_v35 = vsub.f32 %v1126_v15, %v460_v27  ;;  %v484_v5 = vand.u32 4294901760, %v483_v62  ;;  %vm713_vm3 = vcmask 121856  }
  0x17   :  { %294 = vmatpush.msra.mxu1 %v986_v14  ;;  %370 = vmatpush.msrb.mxu0 %v995_v18  ;;  %v448_v14 = vand.u32 4294901760, %v1095_v2  ;;  %v454_v22 = vand.u32 4294901760, %v1112_v9  ;;  %v479_v45 = vsub.f32 %v1160_v34, %v478_v38  ;;  %vm885_vm4 = vcmask 9216  }
  0x18   :  { %189 = vmatmul.f32.vlgmr.msrb.gmra.mxu1 %v984_v13  ;;  %566 = vmatpush.msrb.mxu3 %v995_v18  ;;  %v472_v36 = vand.u32 4294901760, %v1150_v28  ;;  %v462_v39 = vand.u32 4294901760, %v461_v35  ;;  %v485_v11 = vsub.f32 %v483_v62, %v484_v5 }
  0x19   :  { %415 = vmatpush.msrb.mxu1 %v414_v0  ;;  %372 = vmatpush.msrb.mxu0 %v1007_v25  ;;  %v449_v24 = vsub.f32 %v1095_v2, %v448_v14  ;;  %v455_v31 = vsub.f32 %v1112_v9, %v454_v22  ;;  %v480_v53 = vand.u32 4294901760, %v479_v45  ;;  %v354_v0 = vld [vmem:[%s1280_s2 + $0x8] sm:$0xff] }
  0x1a   :  { %325 = vmatmul.f32.vlgmr.msra.gmra.mxu2 %v984_v13  ;;  %568 = vmatpush.msrb.mxu3 %v1007_v25  ;;  %v473_v41 = vsub.f32 %v1150_v28, %v472_v36  ;;  %v1220_v7 = vand.u32 4294901760, %v354_v0 }
  0x1b   :  { %348 = vmatmul.f32.vlgmr.msra.gmra.mxu3 %v984_v13  ;;  %421 = vmatpush.msrb.mxu1 %v420_v6  ;;  %v438_v13 = vand.u32 4294901760, %v437_v12  ;;  %v456_v37 = vand.u32 4294901760, %v455_v31  ;;  %v489_v6 = vsub.f32 %v355_v58, %v1212_v63 }
  0x1c   :  { %374 = vmatpush.msrb.mxu0 %v1014_v29  ;;  %516 = vmatpush.msrb.mxu2 %v1032_v40  ;;  %v474_v48 = vand.u32 4294901760, %v473_v41 }
  0x1d   :  { %427 = vmatpush.msrb.mxu1 %v426_v10  ;;  %570 = vmatpush.msrb.mxu3 %v1014_v29  ;;  %v353_v10 = vld [vmem:[%s1280_s2] sm:$0xff]  ;;  %v490_v12 = vand.u32 4294901760, %v489_v6 }
  0x1e   :  { %376 = vmatpush.msrb.mxu0 %v1037_v44  ;;  %519 = vmatpush.msrb.mxu2 %v1035_v43  ;;  %v399_v21 = vand.u32 4294901760, %v353_v10 }
  0x1f   :  { %273 = vmatmul.f32.vlgmr.msra.gmra.mxu0 %v1001_v20  ;;  %433 = vmatpush.msrb.mxu1 %v432_v19  ;;  %v450_v20 = vand.u32 4294901760, %v449_v24  ;;  %v495_v19 = vsub.f32 %v354_v0, %v1220_v7  ;;  %v491_v24 = vsub.f32 %v489_v6, %v490_v12 }
  0x20   :  { %378 = vmatpush.msrb.mxu0 %v1043_v47  ;;  %298 = vmatmul.f32.vlgmr.msra.gmra.mxu1 %v1011_v26  ;;  %v467_v26 = vsub.f32 %v1133_v17, %v466_v33  ;;  %v501_v31 = vsub.f32 %v353_v10, %v399_v21 }
  0x21   :  { %522 = vmatpush.msrb.mxu2 %v1051_v50  ;;  %439 = vmatpush.msrb.mxu1 %v438_v13  ;;  %v486_v13 = vand.u32 4294901760, %v485_v11 }
  0x22   :  { %380 = vmatpush.msrb.mxu0 %v1053_v51  ;;  %572 = vmatpush.msrb.mxu3 %v1037_v44  ;;  %v468_v42 = vand.u32 4294901760, %v467_v26 }
  0x23   :  { %525 = vmatpush.msrb.mxu2 %v1065_v55  ;;  %445 = vmatpush.msrb.mxu1 %v444_v30  ;;  %v496_v30 = vand.u32 4294901760, %v495_v19 }
  0x24   :  { %382 = vmatpush.msrb.mxu0 %v1067_v56  ;;  %574 = vmatpush.msrb.mxu3 %v1043_v47 }
  0x25   :  { %528 = vmatpush.msrb.mxu2 %v1080_v60  ;;  %451 = vmatpush.msrb.mxu1 %v450_v20  ;;  %v492_v20 = vand.u32 4294901760, %v491_v24  ;;  %v497_v35 = vsub.f32 %v495_v19, %v496_v30 }
  0x26   :  { %384 = vmatpush.msrb.mxu0 %v1082_v61  ;;  %576 = vmatpush.msrb.mxu3 %v1053_v51 }
  0x27   :  { %531 = vmatpush.msrb.mxu2 %v1095_v2  ;;  %457 = vmatpush.msrb.mxu1 %v456_v37  ;;  %v502_v37 = vand.u32 4294901760, %v501_v31  ;;  %v498_v26 = vand.u32 4294901760, %v497_v35  ;;  %v932_v35 = vmov 0  }
  0x28   :  { %386 = vmatpush.msrb.mxu0 %v1097_v3  ;;  %578 = vmatpush.msrb.mxu3 %v1067_v56 }
  0x29   :  { %534 = vmatpush.msrb.mxu2 %v1112_v9  ;;  %463 = vmatpush.msrb.mxu1 %v462_v39  ;;  %v503_v39 = vsub.f32 %v501_v31, %v502_v37 }
  0x2a   :  { %388 = vmatpush.msrb.mxu0 %v1101_v4  ;;  %580 = vmatpush.msrb.mxu3 %v1082_v61 }
  0x2b   :  { %537 = vmatpush.msrb.mxu2 %v1126_v15  ;;  %469 = vmatpush.msrb.mxu1 %v468_v42  ;;  %v504_v41 = vand.u32 4294901760, %v503_v39 }
  0x2c   :  { %390 = vmatpush.msrb.mxu0 %v1128_v16  ;;  %582 = vmatpush.msrb.mxu3 %v1097_v3 }
  0x2d   :  { %540 = vmatpush.msrb.mxu2 %v1133_v17  ;;  %475 = vmatpush.msrb.mxu1 %v474_v48 }
  0x2e   :  { %392 = vmatpush.msrb.mxu0 %v1140_v23  ;;  %584 = vmatpush.msrb.mxu3 %v1101_v4 }
  0x2f   :  { %543 = vmatpush.msrb.mxu2 %v1150_v28  ;;  %481 = vmatpush.msrb.mxu1 %v480_v53  ;;  %v711_v28 = vld [vmem:[%s1281_s3] sm:$0xff] }
  0x30   :  { %586 = vmatpush.msrb.mxu3 %v1128_v16  ;;  %394 = vmatpush.msrb.mxu0 %v1206_v57 }
  0x31   :  { %546 = vmatpush.msrb.mxu2 %v1160_v34  ;;  %487 = vmatpush.msrb.mxu1 %v486_v13  ;;  %v737_v34 = vand.u32 4294901760, %v711_v28 }
  0x32   :  { %588 = vmatpush.msrb.mxu3 %v1140_v23  ;;  %396 = vmatpush.msrb.mxu0 %v1212_v63 }
  0x33   :  { %549 = vmatpush.msrb.mxu2 %v483_v62  ;;  %493 = vmatpush.msrb.mxu1 %v492_v20 }
  0x34   :  { %590 = vmatpush.msrb.mxu3 %v1206_v57  ;;  %398 = vmatpush.msrb.mxu0 %v1220_v7 }
  0x35   :  { %552 = vmatpush.msrb.mxu2 %v489_v6  ;;  %499 = vmatpush.msrb.mxu1 %v498_v26 }
  0x36   :  { %592 = vmatpush.msrb.mxu3 %v1212_v63  ;;  %400 = vmatpush.msrb.mxu0 %v399_v21 }
  0x37   :  { %555 = vmatpush.msrb.mxu2 %v495_v19  ;;  %505 = vmatpush.msrb.mxu1 %v504_v41 }
  0x38   :  { %594 = vmatpush.msrb.mxu3 %v1220_v7  ;;  %607 = vmatpush.msra.mxu0 %v412_v46 }
  0x39   :  { %558 = vmatpush.msrb.mxu2 %v501_v31  ;;  %674 = vmatpush.msra.mxu1 %v995_v18 }
  0x3a   :  { %596 = vmatpush.msrb.mxu3 %v399_v21  ;;  %611 = vmatpush.msra.mxu0 %v418_v49 }
  0x3b   :  { %676 = vmatpush.msra.mxu1 %v1007_v25  ;;  %905 = vset.pattern.permute.xlu0 %v932_v35 }
  0x3c   :  { %615 = vmatpush.msra.mxu0 %v424_v52 }
  0x3d   :  { %678 = vmatpush.msra.mxu1 %v1014_v29 }
  0x3e   :  { %619 = vmatpush.msra.mxu0 %v430_v59 }
  0x3f   :  { %680 = vmatpush.msra.mxu1 %v1037_v44 }
  0x40   :  { %623 = vmatpush.msra.mxu0 %v436_v1 }
  0x41   :  { %682 = vmatpush.msra.mxu1 %v1043_v47 }
  0x42   :  { %627 = vmatpush.msra.mxu0 %v442_v8 }
  0x43   :  { %684 = vmatpush.msra.mxu1 %v1053_v51 }
  0x44   :  { %631 = vmatpush.msra.mxu0 %v448_v14 }
  0x45   :  { %686 = vmatpush.msra.mxu1 %v1067_v56 }
  0x46   :  { %635 = vmatpush.msra.mxu0 %v454_v22  ;;  %v712_v22 = vld [vmem:[%s1281_s3 + $0x8] sm:$0x7f]  ;;  %s933_s3 = smov [#allocation2]  }
  0x47   :  { %688 = vmatpush.msra.mxu1 %v1082_v61  ;;  %s892_s30 = sshll.u32 %s933_s3, 4  ;;  %s893_s30 = int_to_ptr.vmem [resolvable:$true] %s892_s30 }
  0x48   :  { %639 = vmatpush.msra.mxu0 %v460_v27 }
  0x49   :  { %690 = vmatpush.msra.mxu1 %v1097_v3 }
  0x4a   :  { %643 = vmatpush.msra.mxu0 %v466_v33 }
  0x4b   :  { %692 = vmatpush.msra.mxu1 %v1101_v4 }
  0x4c   :  { %647 = vmatpush.msra.mxu0 %v472_v36 }
  0x4d   :  { %694 = vmatpush.msra.mxu1 %v1128_v16 }
  0x4e   :  { %651 = vmatpush.msra.mxu0 %v478_v38  ;;  %v769_v38 = vsub.f32 %v711_v28, %v737_v34 }
  0x4f   :  { %696 = vmatpush.msra.mxu1 %v1140_v23  ;;  %v719_v23 = vsel %vm717_vm2, %v712_v22, 0 }
  0x50   :  { %655 = vmatpush.msra.mxu0 %v484_v5  ;;  %v735_v27 = vand.u32 4294901760, %v719_v23  ;;  %v770_v45 = vand.u32 4294901760, %v769_v38 }
  0x51   :  { %698 = vmatpush.msra.mxu1 %v1206_v57 }
  0x52   :  { %659 = vmatpush.msra.mxu0 %v490_v12  ;;  %v763_v33 = vsub.f32 %v719_v23, %v735_v27  ;;  %736 = vmatpush.msra.mxu2 %v735_v27  ;;  %v771_v53 = vsub.f32 %v769_v38, %v770_v45 }
  0x53   :  { %700 = vmatpush.msra.mxu1 %v1212_v63 }
  0x54   :  { %663 = vmatpush.msra.mxu0 %v496_v30  ;;  %v764_v36 = vand.u32 4294901760, %v763_v33  ;;  %738 = vmatpush.msra.mxu2 %v737_v34  ;;  %v772_v54 = vand.u32 4294901760, %v771_v53 }
  0x55   :  { %702 = vmatpush.msra.mxu1 %v1220_v7 }
  0x56   :  { %667 = vmatpush.msra.mxu0 %v502_v37  ;;  %v765_v42 = vsub.f32 %v763_v33, %v764_v36 }
  0x57   :  { %704 = vmatpush.msra.mxu1 %v399_v21 }
  0x58   :  { %v766_v48 = vand.u32 4294901760, %v765_v42 }
  0x5a   :  { %767 = vmatpush.msra.mxu3 %v766_v48 }
  0x5c   :  { %773 = vmatpush.msra.mxu3 %v772_v54 }
  0x8b   :  { %v58_v18 = vpop.f32.mrf.mxu0 }
  0x8d   :  { %v89_v25 = vpop.f32.mrf.mxu1  ;;  %v115_v29 = vpop.f32.mrf.mxu2 }
  0x8e   :  { %v140_v32 = vpop.f32.mrf.mxu3  ;;  %v90_v40 = vadd.f32 %v89_v25, %v58_v18 }
  0x90   :  { %v116_v47 = vadd.f32 %v115_v29, %v90_v40 }
  0x92   :  { %v141_v51 = vadd.f32 %v140_v32, %v116_v47 }
  0x93   :  { %v167_v43 = vpop.f32.mrf.mxu0 }
  0x94   :  { %v168_v60 = vadd.f32 %v167_v43, %v141_v51 }
  0x95   :  { %v190_v44 = vpop.f32.mrf.mxu1  ;;  %v217_v46 = vpop.f32.mrf.mxu2 }
  0x96   :  { %v248_v49 = vpop.f32.mrf.mxu3  ;;  %v191_v3 = vadd.f32 %v190_v44, %v168_v60 }
  0x97   :  { %v249_v50 = vadd.f32 %v248_v49, %v217_v46 }
  0x9c   :  { %v274_v52 = vpop.f32.mrf.mxu0 }
  0x9d   :  { %v275_v55 = vadd.f32 %v274_v52, %v249_v50  ;;  %v299_v56 = vpop.f32.mrf.mxu1  ;;  %v326_v59 = vpop.f32.mrf.mxu2 }
  0x9e   :  { %v349_v1 = vpop.f32.mrf.mxu3 }
  0x9f   :  { %v300_v61 = vadd.f32 %v299_v56, %v275_v55 }
  0xa1   :  { %v327_v2 = vadd.f32 %v326_v59, %v300_v61 }
  0xa3   :  { %v350_v4 = vadd.f32 %v349_v1, %v327_v2 }
  0xa5   :  { %v352_v8 = vmul.f32 %v350_v4, %v191_v3 }
  0xa7   :  { %v401_v9 = vand.u32 4294901760, %v352_v8 }
  0xa9   :  { %v402_v14 = vsub.f32 %v352_v8, %v401_v9  ;;  %507 = vmatmul.f32.vlgmr.msrb.gmra.mxu1 %v401_v9 }
  0xab   :  { %561 = vmatmul.f32.vlgmr.msrb.gmra.mxu2 %v402_v14  ;;  %v403_v15 = vand.u32 4294901760, %v402_v14 }
  0xac   :  { %795 = vmatpush.msrb.mxu2 %v763_v33 }
  0xad   :  { %600 = vmatmul.f32.vlgmr.msrb.gmra.mxu3 %v403_v15  ;;  %v404_v16 = vsub.f32 %v402_v14, %v403_v15 }
  0xae   :  { %798 = vmatpush.msrb.mxu2 %v769_v38  ;;  %820 = vmatpush.msrb.mxu3 %v735_v27 }
  0xaf   :  { %v405_v17 = vand.u32 4294901760, %v404_v16 }
  0xb0   :  { %822 = vmatpush.msrb.mxu3 %v737_v34 }
  0xb1   :  { %406 = vmatmul.f32.vlgmr.msrb.gmra.mxu0 %v405_v17  ;;  %706 = vmatmul.f32.vlgmr.msra.gmra.mxu1 %v401_v9 }
  0xb9   :  { %669 = vmatmul.f32.vlgmr.msra.gmra.mxu0 %v401_v9 }
 0x126   :  { %v508_v57 = vpop.f32.mrf.mxu1 }
 0x12e   :  { %v407_v58 = vpop.f32.mrf.mxu0  ;;  %v562_v63 = vpop.f32.mrf.mxu2 }
 0x12f   :  { %v509_v62 = vadd.f32 %v508_v57, %v407_v58  ;;  %v707_v11 = vpop.f32.mrf.mxu1 }
 0x130   :  { %v601_v5 = vpop.f32.mrf.mxu3 }
 0x131   :  { %v563_v0 = vadd.f32 %v562_v63, %v509_v62 }
 0x133   :  { %v602_v6 = vadd.f32 %v601_v5, %v563_v0 }
 0x136   :  { %v670_v7 = vpop.f32.mrf.mxu0 }
 0x137   :  { %v671_v10 = vadd.f32 %v670_v7, %v602_v6 }
 0x139   :  { %v708_v12 = vadd.f32 %v707_v11, %v671_v10 }
 0x13b   :  { %v710_v19 = vmax.f32 %v708_v12, 0.0 }
 0x13d   :  { %v715_v21 = vsel %vm713_vm3, %v710_v19, 0 }
 0x13e   :  { %v739_v13 = vand.u32 4294901760, %v715_v21 }
 0x140   :  { %v740_v24 = vsub.f32 %v715_v21, %v739_v13  ;;  %775 = vmatmul.f32.vlgmr.msra.gmra.mxu3 %v739_v13 }
 0x141   :  { %872 = vmatpush.msra.mxu3 %v735_v27 }
 0x142   :  { %v741_v30 = vand.u32 4294901760, %v740_v24 }
 0x143   :  { %874 = vmatpush.msra.mxu3 %v737_v34 }
 0x144   :  { %v742_v31 = vsub.f32 %v740_v24, %v741_v30 }
 0x146   :  { %v743_v20 = vand.u32 4294901760, %v742_v31 }
 0x148   :  { %744 = vmatmul.f32.vlgmr.msra.gmra.mxu2 %v743_v20  ;;  %826 = vmatmul.f32.vlgmr.msrb.gmra.mxu3 %v741_v30 }
 0x149   :  { %847 = vmatpush.msra.mxu2 %v764_v36 }
 0x14b   :  { %851 = vmatpush.msra.mxu2 %v770_v45 }
 0x150   :  { %801 = vmatmul.f32.vlgmr.msrb.gmra.mxu2 %v740_v24  ;;  %876 = vmatmul.f32.vlgmr.msra.gmra.mxu3 %v739_v13 }
 0x158   :  { %853 = vmatmul.f32.vlgmr.msra.gmra.mxu2 %v739_v13 }
 0x1c3   :  { %v776_v37 = vpop.f32.mrf.mxu3 }
 0x1cb   :  { %v745_v26 = vpop.f32.mrf.mxu2  ;;  %v827_v39 = vpop.f32.mrf.mxu3 }
 0x1cc   :  { %v777_v18 = vadd.f32 %v776_v37, %v745_v26 }
 0x1d3   :  { %v802_v41 = vpop.f32.mrf.mxu2  ;;  %v877_v43 = vpop.f32.mrf.mxu3 }
 0x1d4   :  { %v803_v25 = vadd.f32 %v802_v41, %v777_v18 }
 0x1d6   :  { %v828_v29 = vadd.f32 %v827_v39, %v803_v25 }
 0x1db   :  { %v854_v32 = vpop.f32.mrf.mxu2 }
 0x1dc   :  { %v855_v40 = vadd.f32 %v854_v32, %v828_v29 }
 0x1de   :  { %v878_v44 = vadd.f32 %v877_v43, %v855_v40 }
 0x1e0   :  { %882 = vperm.xlu0 %905, %v878_v44  }
 0x252   :  { %v883_v46 = vpop.permute.xlu0 %882 }
 0x253   :  { %886 = vst.msk [vmem:[#allocation2] sm:$0x3] %vm885_vm4, %v883_v46 }
 0x254   :  { %897 = dma.vmem_to_hbm [thread:$0]  %s893_s30, 32, %s895_s7, [#allocation3]  }
 0x255   :  { %930 = dma.done.wait [#allocation3], 32  }
 0x256   :  { %931 = vsyncadd [#allocation3], 4294967264 }
 0x257   :  { %902 = vsyncpa [#allocation3], 1 }

</bundles_post_ra>
